<compile_context>
chip_gen: v6e
topology: v6e:2x2x1
jax: 0.10.0
libtpu: 0.0.40
codegen_flags: <defaults>
</compile_context>

<pallas_src>
import functools

import jax
import jax.numpy as jnp
from jax.experimental import pallas as pl
from jax.experimental.pallas import tpu as pltpu

_LANE = 128
_MIB = 1024 * 1024


def _round_up(x, m):
    return (x + m - 1) // m * m


def _vmem_capacity_bytes():
    """Physical VMEM of one TensorCore; conservative v7x fallback off-device."""
    try:
        info = pltpu.get_tpu_info()
        cap = getattr(info, "vmem_capacity_bytes", None)
        if cap:
            return int(cap)
    except Exception:
        pass
    return 64 * _MIB  # v7x per-TC VMEM (smallest of v5e/v6e/v7x)


def _pick_row_tile(M, block_rows, tm_cap_from_vmem):
    """Pick the row-tile height.

    Rules (perf review):
      * as large as VMEM allows (amortize ~0.35us/grid-step overhead),
      * but always >= 2 tiles (v7x has 2 TensorCores; grid=(1,) also disables
        input/output pipelining on every generation),
      * prefer an even number of tiles,
      * multiple of 8 (sublane) unless it equals the full M.
    """
    tm_cap = max(8, min(block_rows, tm_cap_from_vmem))
    if M <= 8:
        return M  # tiny input: one full-height tile
    if M <= 2 * tm_cap:
        # Split into (at least) two tiles even when everything would fit in one.
        return max(8, min(tm_cap, _round_up(pl.cdiv(M, 2), 8)))
    tm = tm_cap
    n = pl.cdiv(M, tm)
    if n % 2 == 1:
        tm = max(8, _round_up(pl.cdiv(M, n + 1), 8))
    return tm


def _fused_mlp_kernel(x_ref, *refs, num_layers):
    """Run every MLP layer on one row-tile of x, entirely inside VMEM.

    refs = (w0, b0, w1, b1, ..., w_{L-1}, b_{L-1}, o_ref)
      x_ref : (tm, K0)     f32 (unpadded feature dim; cast to bf16 here)
      w_l   : (Kp, Np)     bf16  (resident: constant block index)
      b_l   : (1, Np)      f32
      o_ref : (tm, NLp)    out_dtype (lane-dense padded)
    """
    o_ref = refs[-1]
    wb_refs = refs[:-1]

    # Cast the streamed row tile to bf16 in-kernel (no HBM repack pass).
    h = x_ref[...].astype(wb_refs[0].dtype)
    for layer in range(num_layers):                      # static trace-time unroll
        w = wb_refs[2 * layer][...]
        b = wb_refs[2 * layer + 1][...]
        acc = jnp.dot(h, w, preferred_element_type=jnp.float32)   # MXU, f32 acc
        acc = acc + b                                    # f32 epilogue (v5e-safe)
        if layer < num_layers - 1:
            acc = jnp.maximum(acc, 0.0)                  # ReLU
            # TODO(synk): training-mode dropout (identity in eval mode).
            h = acc.astype(w.dtype)                      # bf16 for next MXU pass
        else:
            o_ref[...] = acc.astype(o_ref.dtype)
    # TODO(synk): on v5e, if the bundle shows VALU as the binding slot, fold the
    # bias add into the (already zero-padded) next weight matrix via a constant-1
    # activation lane, leaving only ReLU + cast on the VPU.


def prepare_mlp_params(params, compute_dtype=jnp.bfloat16):
    """Pad/cast weights ONCE (hoisted out of the per-call path).

    params: list of (w, b), w: (in, out) f32, b: (out,) f32.
    Returns (prepared, dims) where prepared weights have lane-dense (128-mult)
    output dims, zero-padded so padded lanes stay exactly 0 through bias+ReLU.
    The FIRST layer's input dim is left unpadded (x is streamed unpadded).
    """
    dims = [params[0][0].shape[0]] + [w.shape[1] for (w, _) in params]
    pdims = [dims[0]] + [_round_up(d, _LANE) for d in dims[1:]]
    prepared = []
    for li, (w, b) in enumerate(params):
        kin, kout = w.shape
        wp = jnp.zeros((pdims[li], pdims[li + 1]), compute_dtype)
        wp = wp.at[:kin, :kout].set(w.astype(compute_dtype))
        bp = jnp.zeros((1, pdims[li + 1]), jnp.float32).at[0, :kout].set(
            b.astype(jnp.float32))
        prepared.append((wp, bp))
    return prepared, tuple(dims)


def mlp_forward(prepared_params, dims, x, *, block_rows=2048,
                out_dtype=jnp.float32, slice_output=True):
    """Fused MLP forward: y = lin_L(relu(...relu(lin_1(x))...)).

    prepared_params / dims: output of prepare_mlp_params.
    x: (num_nodes, in_channels), any float dtype (cast to bf16 in-kernel).
    out_dtype: set to jnp.bfloat16 to halve output HBM writeback if the
      consumer tolerates it; slice_output=False returns the padded slab and
      skips the extra read+write pass of the eager slice.
    """
    num_layers = len(prepared_params)
    M, K0 = x.shape
    assert K0 == dims[0], f"x feature dim {K0} != param in_channels {dims[0]}"
    n_out = dims[-1]
    pdims = [K0] + [w.shape[1] for (w, _) in prepared_params]
    n_out_p = pdims[-1]
    out_itemsize = jnp.dtype(out_dtype).itemsize

    # ---- VMEM budgeting (review: right-size the limit, derive tm from it) ----
    vmem_cap = _vmem_capacity_bytes()
    weights_bytes = sum(w.size * w.dtype.itemsize + b.size * b.dtype.itemsize
                        for (w, b) in prepared_params)
    max_pdim = max(pdims)
    per_row_bytes = (
        2 * K0 * x.dtype.itemsize          # x stream, double-buffered
        + 2 * n_out_p * out_itemsize       # out stream, double-buffered
        + max_pdim * (4 + 2)               # live f32 acc + bf16 h per row
    )
    # Weights counted at 2x (default BlockSpec double-buffering).
    pipeline_budget = max(4 * _MIB, int(0.6 * vmem_cap) - 2 * weights_bytes)
    tm_cap_from_vmem = max(8, (pipeline_budget // per_row_bytes) // 8 * 8)

    tm = _pick_row_tile(M, block_rows, tm_cap_from_vmem)
    grid = (pl.cdiv(M, tm),)

    needed_bytes = 2 * weights_bytes + tm * per_row_bytes
    vmem_limit = int(min(max(needed_bytes + 8 * _MIB, 16 * _MIB),
                         0.75 * vmem_cap))

    # ---- Specs ----
    # x: unpadded feature dim (block == full dim is legal); cast in-kernel.
    in_specs = [pl.BlockSpec((tm, K0), lambda i: (i, 0))]
    flat_inputs = [x]
    for (wp, bp) in prepared_params:
        # Constant block index -> DMA'd once, resident across all row tiles.
        in_specs.append(pl.BlockSpec(wp.shape, lambda i: (0, 0)))
        in_specs.append(pl.BlockSpec(bp.shape, lambda i: (0, 0)))
        flat_inputs.extend([wp, bp])

    out_specs = pl.BlockSpec((tm, n_out_p), lambda i: (i, 0))
    out_shape = jax.ShapeDtypeStruct((M, n_out_p), out_dtype)

    flops = 2 * M * sum(pdims[l] * pdims[l + 1] for l in range(num_layers))
    bytes_accessed = (M * K0 * x.dtype.itemsize
                      + weights_bytes
                      + M * n_out_p * out_itemsize)
    cost = pl.CostEstimate(flops=flops, transcendentals=0,
                           bytes_accessed=bytes_accessed)

    kernel = functools.partial(_fused_mlp_kernel, num_layers=num_layers)
    yp = pl.pallas_call(
        kernel,
        out_shape=out_shape,
        grid_spec=pltpu.PrefetchScalarGridSpec(
            num_scalar_prefetch=0,
            grid=grid,
            in_specs=in_specs,
            out_specs=out_specs,
        ),
        compiler_params=pltpu.CompilerParams(
            dimension_semantics=("parallel",),   # row tiles shard across TCs
            vmem_limit_bytes=vmem_limit,
        ),
        cost_estimate=cost,
    )(*flat_inputs)

    if slice_output:
        return yp[:, :n_out]
    return yp


def init_mlp_params(key, in_channels, hidden_channels, out_channels, num_layers):
    """Mirrors torch.nn.Linear default init: U[-1/sqrt(fan_in), +1/sqrt(fan_in)]."""
    dims = [in_channels] + [hidden_channels] * (num_layers - 1) + [out_channels]
    params = []
    for li in range(num_layers):
        fan_in, fan_out = dims[li], dims[li + 1]
        key, kw, kb = jax.random.split(key, 3)
        bound = 1.0 / jnp.sqrt(jnp.float32(fan_in))
        # Stored already transposed relative to torch: (in, out).
        w = jax.random.uniform(kw, (fan_in, fan_out), jnp.float32, -bound, bound)
        b = jax.random.uniform(kb, (fan_out,), jnp.float32, -bound, bound)
        params.append((w, b))
    return params


def mlp_reference(params, x):
    """Pure-JAX reference mirroring the kernel's bf16-in / f32-accumulate math."""
    h = x.astype(jnp.bfloat16)
    for li, (w, b) in enumerate(params):
        acc = jnp.dot(h, w.astype(jnp.bfloat16),
                      preferred_element_type=jnp.float32) + b.astype(jnp.float32)
        if li < len(params) - 1:
            acc = jnp.maximum(acc, 0.0)
            h = acc.astype(jnp.bfloat16)
        else:
            return acc


if __name__ == "__main__":
    key = jax.random.PRNGKey(0)

    # Small shapes consistent with the module (ogb-proteins-ish, scaled down).
    num_nodes = 64
    in_channels = 32
    hidden_channels = 64
    out_channels = 16
    num_layers = 3
    dropout = 0.5  # identity in inference mode

    key, kx, kp = jax.random.split(key, 3)
    x = jax.random.normal(kx, (num_nodes, in_channels), jnp.float32)
    params = init_mlp_params(kp, in_channels, hidden_channels, out_channels,
                             num_layers)

    # Padding / bf16 casting of the weights happens once, outside the call path.
    prepared_params, dims = prepare_mlp_params(params)

    out = mlp_forward(prepared_params, dims, x)
    out = jax.block_until_ready(out)

    ref = mlp_reference(params, x)
    assert out.shape == (num_nodes, out_channels)
    max_err = float(jnp.max(jnp.abs(out - ref)))
    assert jnp.allclose(out, ref, atol=5e-2, rtol=5e-2), (
        f"mismatch vs reference, max abs err {max_err}")

    print("KERNEL_OK")
</pallas_src>

<mosaic_0001>
module attributes {stable_mosaic.version = 11 : i64} {
  func.func @_fused_mlp_kernel(%arg0: i32, %arg1: memref<32x32xf32, #tpu.memory_space<vmem>>, %arg2: memref<32x128xbf16, #tpu.memory_space<vmem>>, %arg3: memref<1x128xf32, #tpu.memory_space<vmem>>, %arg4: memref<128x128xbf16, #tpu.memory_space<vmem>>, %arg5: memref<1x128xf32, #tpu.memory_space<vmem>>, %arg6: memref<128x128xbf16, #tpu.memory_space<vmem>>, %arg7: memref<1x128xf32, #tpu.memory_space<vmem>>, %arg8: memref<32x128xf32, #tpu.memory_space<vmem>>) attributes {dimension_semantics = [#tpu.dimension_semantics<parallel>], iteration_bounds = array<i64: 2>, scalar_prefetch = 0 : i64, scratch_operands = 0 : i64, tpu.core_type = #tpu.core_type<tc>, window_params = [{transform_indices = @transform_0, window_bounds = array<i64: 32, 32>}, {pipeline_mode = #tpu.pipeline_mode<synchronous>, transform_indices = @transform_1, window_bounds = array<i64: 32, 128>}, {pipeline_mode = #tpu.pipeline_mode<synchronous>, transform_indices = @transform_2, window_bounds = array<i64: 1, 128>}, {pipeline_mode = #tpu.pipeline_mode<synchronous>, transform_indices = @transform_3, window_bounds = array<i64: 128, 128>}, {pipeline_mode = #tpu.pipeline_mode<synchronous>, transform_indices = @transform_4, window_bounds = array<i64: 1, 128>}, {pipeline_mode = #tpu.pipeline_mode<synchronous>, transform_indices = @transform_5, window_bounds = array<i64: 128, 128>}, {pipeline_mode = #tpu.pipeline_mode<synchronous>, transform_indices = @transform_6, window_bounds = array<i64: 1, 128>}, {transform_indices = @transform_7, window_bounds = array<i64: 32, 128>}]} {
    %c0 = arith.constant 0 : index
    %c0_0 = arith.constant 0 : index
    %0 = vector.load %arg1[%c0, %c0_0] : memref<32x32xf32, #tpu.memory_space<vmem>>, vector<32x32xf32>
    %1 = arith.truncf %0 : vector<32x32xf32> to vector<32x32xbf16>
    %c0_1 = arith.constant 0 : index
    %c0_2 = arith.constant 0 : index
    %2 = vector.load %arg2[%c0_1, %c0_2] : memref<32x128xbf16, #tpu.memory_space<vmem>>, vector<32x128xbf16>
    %c0_3 = arith.constant 0 : index
    %c0_4 = arith.constant 0 : index
    %3 = vector.load %arg3[%c0_3, %c0_4] : memref<1x128xf32, #tpu.memory_space<vmem>>, vector<1x128xf32>
    %cst = arith.constant dense<0.000000e+00> : vector<32x128xf32>
    %4 = tpu.matmul %1, %2, %cst {dimension_numbers = #tpu.dot_dimension_numbers<[1], [0], [0], [1], [0, 0, 1, 1], [], []>} : vector<32x32xbf16>, vector<32x128xbf16>, vector<32x128xf32> -> vector<32x128xf32>
    %5 = vector.broadcast %3 : vector<1x128xf32> to vector<32x128xf32>
    %6 = arith.addf %4, %5 : vector<32x128xf32>
    %cst_5 = arith.constant 0.000000e+00 : f32
    %7 = vector.broadcast %cst_5 : f32 to vector<32x128xf32>
    %8 = arith.maximumf %6, %7 : vector<32x128xf32>
    %9 = arith.truncf %8 : vector<32x128xf32> to vector<32x128xbf16>
    %c0_6 = arith.constant 0 : index
    %c0_7 = arith.constant 0 : index
    %10 = vector.load %arg4[%c0_6, %c0_7] : memref<128x128xbf16, #tpu.memory_space<vmem>>, vector<128x128xbf16>
    %c0_8 = arith.constant 0 : index
    %c0_9 = arith.constant 0 : index
    %11 = vector.load %arg5[%c0_8, %c0_9] : memref<1x128xf32, #tpu.memory_space<vmem>>, vector<1x128xf32>
    %cst_10 = arith.constant dense<0.000000e+00> : vector<32x128xf32>
    %12 = tpu.matmul %9, %10, %cst_10 {dimension_numbers = #tpu.dot_dimension_numbers<[1], [0], [0], [1], [0, 0, 1, 1], [], []>} : vector<32x128xbf16>, vector<128x128xbf16>, vector<32x128xf32> -> vector<32x128xf32>
    %13 = vector.broadcast %11 : vector<1x128xf32> to vector<32x128xf32>
    %14 = arith.addf %12, %13 : vector<32x128xf32>
    %cst_11 = arith.constant 0.000000e+00 : f32
    %15 = vector.broadcast %cst_11 : f32 to vector<32x128xf32>
    %16 = arith.maximumf %14, %15 : vector<32x128xf32>
    %17 = arith.truncf %16 : vector<32x128xf32> to vector<32x128xbf16>
    %c0_12 = arith.constant 0 : index
    %c0_13 = arith.constant 0 : index
    %18 = vector.load %arg6[%c0_12, %c0_13] : memref<128x128xbf16, #tpu.memory_space<vmem>>, vector<128x128xbf16>
    %c0_14 = arith.constant 0 : index
    %c0_15 = arith.constant 0 : index
    %19 = vector.load %arg7[%c0_14, %c0_15] : memref<1x128xf32, #tpu.memory_space<vmem>>, vector<1x128xf32>
    %cst_16 = arith.constant dense<0.000000e+00> : vector<32x128xf32>
    %20 = tpu.matmul %17, %18, %cst_16 {dimension_numbers = #tpu.dot_dimension_numbers<[1], [0], [0], [1], [0, 0, 1, 1], [], []>} : vector<32x128xbf16>, vector<128x128xbf16>, vector<32x128xf32> -> vector<32x128xf32>
    %21 = vector.broadcast %19 : vector<1x128xf32> to vector<32x128xf32>
    %22 = arith.addf %20, %21 : vector<32x128xf32>
    %c0_17 = arith.constant 0 : index
    %c0_18 = arith.constant 0 : index
    %23 = vector.load %arg8[%c0_17, %c0_18] : memref<32x128xf32, #tpu.memory_space<vmem>>, vector<32x128xf32>
    tpu.vector_store %arg8[%c0_17, %c0_18], %22 {strides = array<i32>} : memref<32x128xf32, #tpu.memory_space<vmem>>, vector<32x128xf32>,
    return
  }
  func.func @transform_0(%arg0: i32) -> (i32, i32) {
    %c0_i32 = arith.constant 0 : i32
    %c0_i32_0 = arith.constant 0 : i32
    return %arg0, %c0_i32 : i32, i32
  }
  func.func @transform_1(%arg0: i32) -> (i32, i32) {
    %c0_i32 = arith.constant 0 : i32
    %c0_i32_0 = arith.constant 0 : i32
    %c0_i32_1 = arith.constant 0 : i32
    return %c0_i32, %c0_i32_0 : i32, i32
  }
  func.func @transform_2(%arg0: i32) -> (i32, i32) {
    %c0_i32 = arith.constant 0 : i32
    %c0_i32_0 = arith.constant 0 : i32
    %c0_i32_1 = arith.constant 0 : i32
    return %c0_i32, %c0_i32_0 : i32, i32
  }
  func.func @transform_3(%arg0: i32) -> (i32, i32) {
    %c0_i32 = arith.constant 0 : i32
    %c0_i32_0 = arith.constant 0 : i32
    %c0_i32_1 = arith.constant 0 : i32
    return %c0_i32, %c0_i32_0 : i32, i32
  }
  func.func @transform_4(%arg0: i32) -> (i32, i32) {
    %c0_i32 = arith.constant 0 : i32
    %c0_i32_0 = arith.constant 0 : i32
    %c0_i32_1 = arith.constant 0 : i32
    return %c0_i32, %c0_i32_0 : i32, i32
  }
  func.func @transform_5(%arg0: i32) -> (i32, i32) {
    %c0_i32 = arith.constant 0 : i32
    %c0_i32_0 = arith.constant 0 : i32
    %c0_i32_1 = arith.constant 0 : i32
    return %c0_i32, %c0_i32_0 : i32, i32
  }
  func.func @transform_6(%arg0: i32) -> (i32, i32) {
    %c0_i32 = arith.constant 0 : i32
    %c0_i32_0 = arith.constant 0 : i32
    %c0_i32_1 = arith.constant 0 : i32
    return %c0_i32, %c0_i32_0 : i32, i32
  }
  func.func @transform_7(%arg0: i32) -> (i32, i32) {
    %c0_i32 = arith.constant 0 : i32
    %c0_i32_0 = arith.constant 0 : i32
    return %arg0, %c0_i32 : i32, i32
  }
}

</mosaic_0001>

<bundles_post_ra>
// kernel: tpu_custom_call.1
= control target key start
LH: loop header
LB: loop body
LE: loop exit
PB: predicated region body
PF: predicated region fallthrough
CT: control target
= control target key end

     0   :  { %12 = vsyncpa [#allocation3], 0  ;;  %s1203_s0 = inlined_call_operand.vmem [shape: f32[64,32], index: 0, kind: input, shape index: {}]   ;;  %s1204_s1 = inlined_call_operand.vmem [shape: bf16[32,128], index: 1, kind: input, shape index: {}]   ;;  %s1205_s2 = inlined_call_operand.vmem [shape: f32[1,128], index: 2, kind: input, shape index: {}]   ;;  %s1206_s3 = inlined_call_operand.vmem [shape: bf16[128,128], index: 3, kind: input, shape index: {}]   ;;  %s1207_s4 = inlined_call_operand.vmem [shape: f32[1,128], index: 4, kind: input, shape index: {}]   ;;  %s1208_s5 = inlined_call_operand.hbm [shape: bf16[128,128], index: 5, kind: input, shape index: {}]   ;;  %s1209_s6 = inlined_call_operand.vmem [shape: f32[1,128], index: 6, kind: input, shape index: {}]   ;;  %s1210_s7 = inlined_call_operand.hbm [shape: f32[64,128], index: 7, kind: output, shape index: {}]  }
   0x1   :  { %13 = vsyncpa [#allocation4], 0 }
   0x2   :  { %15 = vsyncpa [#allocation4 + $0x1], 0  ;;  %s1045_s24 = smov 0   ;;  %s1047_s25 = smov 0  }
   0x3   :  { %s1049_s26 = smov 0   ;;  %s1051_s27 = smov 0  }
   0x4 LB: > { %s1066_s28 = sadd.s32 4294967295, %s997_s27   ;;  %s725_s29 = sadd.s32 4294967294, %s997_s27   ;;  %s997_s27 = sphi %s1051_s27, %s1218_s27   ;;  %s993_s26 = sphi %s1049_s26, %s1217_s26   ;;  %s989_s25 = sphi %s1047_s25, %s1216_s25   ;;  %s985_s24 = sphi %s1045_s24, %s1215_s24  }
   0x5   : > { %s1070_s30 = sadd.s32 1, %s997_s27   ;;  %s180_s8 = sadd.s32 1, %s993_s26 }
   0x6   : > { %s177_s9 = ssub.s32 %s997_s27, %s1070_s30  ;;  %p190_p0 = scmp.ne.s32.totalorder %s993_s26, %s989_s25 }
   0x7   : > { %p178_p1 = scmp.eq.s32.totalorder %s177_s9, 0  ;;  %p191_p2 = scmp.eq.s32.totalorder %s1066_s28, 1 }
   0x8   : > { %p196_p3 = scmp.ne.s32.totalorder %s989_s25, %s985_s24  ;;  %p197_p4 = scmp.eq.s32.totalorder %s725_s29, 1 }
   0x9   : > { %s1081_s10 = scalar_select %p178_p1, %s993_s26, %s180_s8  }
   0xa   : > { %p1083_p5 = por %p191_p2, %p190_p0  ;;  %p1087_p6 = por %p197_p4, %p196_p3 }
   0xb   : > { %p726_p7 = scmp.ge.s32.totalorder %s997_s27, 1  ;;  %p204_p8 = scmp.lt.s32.totalorder %s997_s27, 3 }
   0xc   : > { %s1212_s12 = scalar_select %p1087_p6, 1, 0 }
   0xd   : > { %p849_p9 = scmp.eq.s32.totalorder %s1066_s28, 0  ;;  %p1094_p10 = pnand %p726_p7, %p204_p8 }
   0xe   : > { %s999_s14 = smov [#allocation2]  }
   0xf   : > { %s228_s15 = sshll.u32 %s999_s14, 4  ;;  %p841_p11 = pneg %p1094_p10  ;;  %s229_s15 = int_to_ptr.vmem [resolvable:$true] %s228_s15 }
  0x10   : > { %s918_s16 = scalar_lea.vmem %s229_s15, 1024  ;;  %p926_p3 = scmp.lt.s32.totalorder %s229_s15, %s229_s15 }
  0x11   : > { %p842_p12 = pnand %p849_p9, %p841_p11  ;;  %p919_p0 = scmp.ne.s32.totalorder %s229_s15, %s918_s16 }
  0x12   : > { %p927_p4 = scmp.lt.s32.totalorder %s918_s16, %s918_s16 }
  0x13   : > { %p909_p13 = pneg %p842_p12 }
  0x14   : > { %p928_p6 = por %p927_p4, %p926_p3 }
  0x15   : > { %p921_p1 = pnand %p919_p0, %p909_p13 }
  0x17   : > { %p922_p2 = pneg %p921_p1 }
  0x19   : > { %p929_p7 = pnand %p928_p6, %p922_p2 }
  0x1b   : > { %932 = shalt.err (!%p929_p7)
}
  0x1c   : > { %s1000_s17 = smov 64   ;;  %s1001_s18 = smov 4  }
  0x1d   : > { %844 = dma.hbm_to_vmem [thread:$0]  (!%p842_p12), %s1208_s5, 1024, %s229_s15, [#allocation3], %s1000_s17, %s1000_s17, %s1001_s18  }
  0x1e   : > { %256 = sbr.rel (%p1094_p10) target bundleno = 673 (0x2a1), region = 48 }
  0x23   : > { %976 = dma.done.wait (%p849_p9), [#allocation3], 1024  }
  0x24   : > { %978 = vsyncadd (%p849_p9), [#allocation3], 4294966272  ;;  %s732_s21 = sshll.u32 %s1066_s28, 2  ;;  %v889_v0 = vld [vmem:[%s1204_s1 + $0x8] sm:$0xff]   ;;  %v890_v1 = vld [vmem:[%s1204_s1] sm:$0xff]   ;;  %vm325_vm0 = vcmask 261120  }
  0x25   : > { %p289_p8 = scmp.lt.s32.totalorder %s732_s21, 7  ;;  %787 = vmatprep.subr.bf16.mxu0 %v889_v0  ;;  %v891_v7 = vld [vmem:[%s1206_s3 + $0x38] sm:$0xff]   ;;  %v892_v8 = vld [vmem:[%s1206_s3 + $0x30] sm:$0xff]   ;;  %v893_v10 = vld [vmem:[%s1206_s3 + $0x28] sm:$0xff]   ;;  %s762_s13 = sshll.u32 %s1066_s28, 9 }
  0x26   : > { %788 = vmatpush3.bf16.msra.mxu0 %v889_v0  ;;  %795 = vmatprep.subr.bf16.mxu1 %v891_v7  ;;  %v894_v11 = vld [vmem:[%s1206_s3 + $0x20] sm:$0xff]   ;;  %v895_v12 = vld [vmem:[%s1206_s3 + $0x18] sm:$0xff]   ;;  %v896_v13 = vld [vmem:[%s1206_s3 + $0x10] sm:$0xff]   ;;  %s1161_s17 = scalar_lea.hbm %s1210_s7, %s762_s13  ;;  %s1002_s19 = smov [#allocation5]  }
  0x27   : > { %s1220_s21 = smov (!%p289_p8, %s732_s21), 7  ;;  %789 = vmatprep.subr.bf16.mxu0 %v890_v1  ;;  %796 = vmatpush3.bf16.msra.mxu1 %v891_v7  ;;  %v897_v14 = vld [vmem:[%s1206_s3 + $0x8] sm:$0xff]   ;;  %v898_v15 = vld [vmem:[%s1206_s3] sm:$0xff]   ;;  %v899_v16 = vld [vmem:[#allocation2 + $0x38] sm:$0xff]   ;;  %s937_s20 = sshll.u32 %s1002_s19, 4  ;;  %s938_s20 = int_to_ptr.vmem [resolvable:$false] %s937_s20 }
  0x28   : > { %s733_s22 = sshll.u32 %s1220_s21, 3  ;;  %797 = vmatprep.subr.bf16.mxu1 %v892_v8  ;;  %v900_v17 = vld [vmem:[#allocation2 + $0x30] sm:$0xff]   ;;  %v901_v18 = vld [vmem:[#allocation2 + $0x28] sm:$0xff]   ;;  %v902_v19 = vld [vmem:[#allocation2 + $0x20] sm:$0xff]   ;;  %s939_s21 = scalar_lea.vmem %s938_s20, 1024 }
  0x29   : > { %s292_s8 = scalar_lea.vmem %s1203_s0, %s733_s22  ;;  %v903_v20 = vld [vmem:[#allocation2 + $0x18] sm:$0xff]   ;;  %v734_v23 = vld [vmem:[%s1205_s2] ss:$0 sm:$0xff]  ;;  %v904_v36 = vld [vmem:[#allocation2 + $0x10] sm:$0xff]   ;;  %s285_s22 = sand.u32 1, %s989_s25  }
  0x2a   : > { %v296_v2 = vld [vmem:[%s292_s8] sm:$0xff]  ;;  %v297_v3 = vld [vmem:[%s292_s8 + $0x8] sm:$0xff]  ;;  %v298_v4 = vld [vmem:[%s292_s8 + $0x10] sm:$0xff]  ;;  %790 = vmatpush3.bf16.msra.mxu0 %v890_v1  ;;  %s731_s23 = sshll.u32 %s285_s22, 5  ;;  %s1163_s18 = scalar_lea.sflag [#allocation4], %s285_s22 }
  0x2b   : > { %v300_v5 = vpack.c.bf16 %v297_v3, %v296_v2  ;;  %v299_v6 = vld [vmem:[%s292_s8 + $0x18] sm:$0xff]  ;;  %798 = vmatpush3.bf16.msra.mxu1 %v892_v8  ;;  %815 = vmatprep.subr.bf16.mxu0 %v899_v16  ;;  %v905_v37 = vld [vmem:[#allocation2 + $0x8] sm:$0xff]   ;;  %v906_v38 = vld [vmem:[#allocation2] sm:$0xff]   ;;  %s287_s9 = scalar_lea.vmem [#allocation5], %s731_s23 }
  0x2c   : > { %v301_v9 = vpack.c.bf16 %v299_v6, %v298_v4  ;;  %799 = vmatprep.subr.bf16.mxu1 %v893_v10  ;;  %v739_v41 = vld [vmem:[%s1207_s4] ss:$0 sm:$0xff]  ;;  %s651_s14 = sshll.u32 %s287_s9, 4  ;;  %s1156_s14 = int_to_ptr.vmem [resolvable:$true] %s651_s14 }
  0x2d   : > { %791 = vmatprep.mubr.msk.bf16.mxu0 %vm325_vm0, %v300_v5  ;;  %v748_v54 = vld [vmem:[%s1209_s6] ss:$0 sm:$0xff]  ;;  %s933_s28 = scalar_lea.vmem %s1156_s14, 512  ;;  %p940_p11 = scmp.lt.s32.totalorder %s1156_s14, %s938_s20 }
  0x2e   : > { %792 = vmatmul.mubr.msk.bf16.vlgmr.msra.gmra.mxu0 %vm325_vm0, %v301_v9  ;;  %p934_p6 = scmp.ne.s32.totalorder %s1156_s14, %s933_s28  ;;  %p941_p12 = scmp.lt.s32.totalorder %s939_s21, %s933_s28 }
  0x2f   : > { %800 = vmatpush3.bf16.msra.mxu1 %v893_v10  ;;  %816 = vmatpush3.bf16.msra.mxu0 %v899_v16 }
  0x30   : > { %801 = vmatprep.subr.bf16.mxu1 %v894_v11  ;;  %817 = vmatprep.subr.bf16.mxu0 %v900_v17  ;;  %p935_p9 = pnand %p934_p6, %p1083_p5  ;;  %p942_p13 = por %p941_p12, %p940_p11 }
  0x32   : > { %p936_p10 = pneg %p935_p9 }
  0x33   : > { %802 = vmatpush3.bf16.msra.mxu1 %v894_v11  ;;  %818 = vmatpush3.bf16.msra.mxu0 %v900_v17 }
  0x34   : > { %803 = vmatprep.subr.bf16.mxu1 %v895_v12  ;;  %819 = vmatprep.subr.bf16.mxu0 %v901_v18  ;;  %p943_p0 = pnand %p942_p13, %p936_p10 }
  0x37   : > { %804 = vmatpush3.bf16.msra.mxu1 %v895_v12  ;;  %820 = vmatpush3.bf16.msra.mxu0 %v901_v18 }
  0x38   : > { %805 = vmatprep.subr.bf16.mxu1 %v896_v13  ;;  %821 = vmatprep.subr.bf16.mxu0 %v902_v19 }
  0x3b   : > { %806 = vmatpush3.bf16.msra.mxu1 %v896_v13  ;;  %822 = vmatpush3.bf16.msra.mxu0 %v902_v19 }
  0x3c   : > { %807 = vmatprep.subr.bf16.mxu1 %v897_v14  ;;  %823 = vmatprep.subr.bf16.mxu0 %v903_v20 }
  0x3f   : > { %808 = vmatpush3.bf16.msra.mxu1 %v897_v14  ;;  %824 = vmatpush3.bf16.msra.mxu0 %v903_v20 }
  0x40   : > { %809 = vmatprep.subr.bf16.mxu1 %v898_v15  ;;  %825 = vmatprep.subr.bf16.mxu0 %v904_v36 }
  0x43   : > { %810 = vmatpush3.bf16.msra.mxu1 %v898_v15  ;;  %826 = vmatpush3.bf16.msra.mxu0 %v904_v36 }
  0x44   : > { %827 = vmatprep.subr.bf16.mxu0 %v905_v37 }
  0x47   : > { %828 = vmatpush3.bf16.msra.mxu0 %v905_v37 }
  0x48   : > { %829 = vmatprep.subr.bf16.mxu0 %v906_v38 }
  0x4b   : > { %830 = vmatpush3.bf16.msra.mxu0 %v906_v38 }
  0xee   : > { %v793_v21 = vpop.f32.mrf.mxu0 }
  0xef   : > { %v375_v27 = vadd.f32 %v793_v21, %v734_v23 }
  0xf0   : > { %v366_v22 = vpop.f32.mrf.mxu0 }
  0xf1   : > { %v367_v25 = vadd.f32 %v734_v23, %v366_v22  ;;  %v383_v33 = vmax.f32 %v375_v27, 0.0 }
  0xf2   : > { %v794_v24 = vpop.f32.mrf.mxu0 }
  0xf3   : > { %v378_v26 = vadd.f32 %v794_v24, %v734_v23  ;;  %v381_v31 = vmax.f32 %v367_v25, 0.0 }
  0xf4   : > { %v369_v28 = vpop.f32.mrf.mxu0 }
  0xf5   : > { %v370_v29 = vadd.f32 %v734_v23, %v369_v28  ;;  %v384_v30 = vmax.f32 %v378_v26, 0.0 }
  0xf7   : > { %v382_v32 = vmax.f32 %v370_v29, 0.0  ;;  %v386_v35 = vpack.c.bf16 %v384_v30, %v383_v33 }
  0xf9   : > { %v385_v34 = vpack.c.bf16 %v382_v32, %v381_v31 }
  0xfb   : > { %811 = vmatprep.mubr.bf16.mxu1 %v385_v34 }
  0xfc   : > { %812 = vmatmul.mubr.bf16.vlgmr.msra.gmra.mxu1 %v386_v35 }
 0x1bc   : > { %v813_v39 = vpop.f32.mrf.mxu1 }
 0x1bd   : > { %v501_v45 = vadd.f32 %v813_v39, %v739_v41 }
 0x1be   : > { %v492_v40 = vpop.f32.mrf.mxu1 }
 0x1bf   : > { %v493_v43 = vadd.f32 %v739_v41, %v492_v40  ;;  %v509_v51 = vmax.f32 %v501_v45, 0.0 }
 0x1c0   : > { %v814_v42 = vpop.f32.mrf.mxu1 }
 0x1c1   : > { %v504_v44 = vadd.f32 %v814_v42, %v739_v41  ;;  %v507_v49 = vmax.f32 %v493_v43, 0.0 }
 0x1c2   : > { %v495_v46 = vpop.f32.mrf.mxu1 }
 0x1c3   : > { %v496_v47 = vadd.f32 %v739_v41, %v495_v46  ;;  %v510_v48 = vmax.f32 %v504_v44, 0.0 }
 0x1c5   : > { %v508_v50 = vmax.f32 %v496_v47, 0.0  ;;  %v512_v53 = vpack.c.bf16 %v510_v48, %v509_v51 }
 0x1c7   : > { %v511_v52 = vpack.c.bf16 %v508_v50, %v507_v49 }
 0x1c9   : > { %831 = vmatprep.mubr.bf16.mxu0 %v511_v52 }
 0x1ca   : > { %832 = vmatmul.mubr.bf16.vlgmr.msra.gmra.mxu0 %v512_v53 }
 0x28a   : > { %v833_v55 = vpop.f32.mrf.mxu0 }
 0x28b   : > { %v627_v56 = vadd.f32 %v833_v55, %v748_v54 }
 0x28c   : > { %v618_v57 = vpop.f32.mrf.mxu0 }
 0x28d   : > { %635 = vst [vmem:[%s287_s9 + $0x10] sm:$0xff] %v627_v56  ;;  %v619_v58 = vadd.f32 %v748_v54, %v618_v57 }
 0x28e   : > { %v834_v59 = vpop.f32.mrf.mxu0 }
 0x28f   : > { %633 = vst [vmem:[%s287_s9] sm:$0xff] %v619_v58  ;;  %v630_v60 = vadd.f32 %v834_v59, %v748_v54 }
 0x290   : > { %v621_v61 = vpop.f32.mrf.mxu0 }
 0x291   : > { %636 = vst [vmem:[%s287_s9 + $0x18] sm:$0xff] %v630_v60  ;;  %v622_v62 = vadd.f32 %v748_v54, %v621_v61 }
 0x293   : > { %634 = vst [vmem:[%s287_s9 + $0x8] sm:$0xff] %v622_v62 }
 0x294   : > { %946 = shalt.err (!%p943_p0)
}
 0x295   : > { %s947_s22 = scalar_lea.hbm %s1161_s17, 512  ;;  %s951_s8 = scalar_lea.hbm %s1210_s7, 1024 }
 0x296   : > { %p948_p1 = scmp.ne.s32.totalorder %s1161_s17, %s947_s22  ;;  %p952_p4 = scmp.lt.s32.totalorder %s1161_s17, %s1210_s7 }
 0x297   : > { %p953_p7 = scmp.lt.s32.totalorder %s951_s8, %s947_s22 }
 0x298   : > { %p949_p2 = pnand %p948_p1, %p1083_p5 }
 0x299   : > { %p954_p8 = por %p953_p7, %p952_p4 }
 0x29a   : > { %p950_p3 = pneg %p949_p2 }
 0x29c   : > { %p955_p6 = pnand %p954_p8, %p950_p3 }
 0x29e   : > { %958 = shalt.err (!%p955_p6)
}
 0x29f   : > { %s1003_s15 = smov 128   ;;  %s1004_s16 = smov 8  }
 0x2a0   : > { %839 = dma.vmem_to_hbm [thread:$0]  (%p1083_p5), %s1156_s14, 512, %s1161_s17, %s1163_s18, %s1003_s15, %s1003_s15, %s1004_s16  }
 0x2a1 PF: > { %p851_p9 = scmp.ge.s32.totalorder %s997_s27, 2  ;;  %s666_s28 = sand.u32 1, %s985_s24  }
 0x2a2   : > { %p1214_p10 = scmp.ne.s32.totalorder %s1212_s12, 0  ;;  %s667_s19 = scalar_lea.sflag [#allocation4], %s666_s28 }
 0x2a4   : > { %p846_p11 = pnand %p851_p9, %p1214_p10 }
 0x2a6   : > { %p847_p12 = pneg %p846_p11 }
 0x2a8   : > { %980 = dma.done.wait (%p847_p12), %s667_s19, 512  }
 0x2a9   : > { %982 = vsyncadd (%p847_p12), %s667_s19, 4294966784  ;;  %p18_p13 = scmp.ge.s32.totalorder %s1070_s30, 4   ;;  %s1215_s24 = smov %s989_s25 }
 0x2aa   : > { %s1216_s25 = smov %s993_s26  ;;  %s1217_s26 = smov %s1081_s10 }
 0x2ab   : > { %s1218_s27 = smov %s1070_s30  ;;  %20 = sbr.rel (!%p18_p13) target bundleno = 4 (0x4), region = 88 }
 0x2b0   :  { %672 = vsyncpa [#allocation3], 1 }
 0x2b1   :  { %674 = vsyncpa [#allocation3 + $0x1], 1 }
 0x2b2   :  { %675 = vsyncpa [#allocation4], 1 }
 0x2b3   :  { %677 = vsyncpa [#allocation4 + $0x1], 1 }

</bundles_post_ra>
